<compile_context>
chip_gen: v6e
topology: v6e:2x2x1
jax: 0.10.0
libtpu: 0.0.40
codegen_flags: <defaults>
</compile_context>

<pallas_src>
import jax
import jax.numpy as jnp
from jax.experimental import pallas as pl
from jax.experimental.pallas import tpu as pltpu

# ----------------------------- model config (small, shape-consistent) --------
B = 2          # batch
S = 8          # sequence length
D = 32         # d_model   (module default 512, scaled down)
H = 4          # heads     (module default 16, scaled down; D % H == 0)
DFF = 64       # dff       (module default 1024, scaled down)
EPS = 1e-5     # LayerNorm eps (torch default)
DH = D // H    # head dim
BS = B * S


# ----------------------------- Pallas kernel ---------------------------------
def decoder_block_kernel(
    x_ref,                      # (S, D)   rows of one batch
    ln_ref,                     # (4, D)   rows: ln1_g, ln1_b, ln2_g, ln2_b
    wqkv_ref, bqkv_ref,         # (D, 3D), (1, 3D)   (Q part pre-scaled)
    wo_ref, bo_ref,             # (D, D), (1, D)
    w1_ref, b1_ref,             # (D, DFF), (1, DFF)
    w2_ref, b2_ref,             # (DFF, D), (1, D)
    o_ref,                      # (S, D)
    ctx_scr,                    # (S, D) f32 scratch: lane-contiguous per-head ctx
):
    x = x_ref[...].astype(jnp.float32)               # (S, D)
    lnp = ln_ref[...]                                 # (4, D)

    def layernorm(v, g, b):
        mu = jnp.mean(v, axis=-1, keepdims=True)
        var = jnp.mean((v - mu) * (v - mu), axis=-1, keepdims=True)
        return (v - mu) * jax.lax.rsqrt(var + EPS) * g + b

    # ---- LN1 + fused QKV projection on this row tile ----
    h = layernorm(x, lnp[0], lnp[1])                                   # (S, D)
    qkv = jnp.dot(h, wqkv_ref[...],
                  preferred_element_type=jnp.float32) + bqkv_ref[...]  # (S, 3D)

    # causal mask, built once (hoisted out of the head loop)
    row = jax.lax.broadcasted_iota(jnp.int32, (S, S), 0)
    col = jax.lax.broadcasted_iota(jnp.int32, (S, S), 1)
    causal = col <= row                                                # (S, S)

    # Static head loop (H small, fully unrolled).  Each head's context lands
    # lane-contiguously in ctx_scr; the output projection is done ONCE below
    # with a full K = D contraction (no per-head K=DH matmuls, no lane concat).
    for hh in range(H):
        lo = hh * DH
        qh = qkv[:, lo:lo + DH]                      # (S, DH), pre-scaled
        kh = qkv[:, D + lo:D + lo + DH]              # (S, DH)
        vh = qkv[:, 2 * D + lo:2 * D + lo + DH]      # (S, DH)

        s = jnp.einsum('qd,kd->qk', qh, kh,
                       preferred_element_type=jnp.float32)             # (S, S)
        s = jnp.where(causal, s, jnp.float32(-1e30))
        s = s - jnp.max(s, axis=-1, keepdims=True)
        p = jnp.exp(s)
        rs = jnp.sum(p, axis=-1, keepdims=True)                        # (S, 1)
        ctx = jnp.dot(p, vh, preferred_element_type=jnp.float32)       # (S, DH)
        # deferred softmax normalisation: scale S*DH elements, not S*S
        # (approx=True would move it fully onto the EUP at looser tolerance).
        ctx_scr[:, lo:lo + DH] = ctx * pl.reciprocal(rs, approx=False)

    # single lane-dense (S, D) @ (D, D) output projection, K = D
    x = x + jnp.dot(ctx_scr[...], wo_ref[...],
                    preferred_element_type=jnp.float32) + bo_ref[...]  # residual 1

    # ---- LN2 + MLP ----
    h2 = layernorm(x, lnp[2], lnp[3])
    m = jnp.dot(h2, w1_ref[...], preferred_element_type=jnp.float32) + b1_ref[...]
    # TODO(synk): mlp.MLP activation not shown in source; tanh-GELU assumed
    # (PyTorch nn.GELU default is exact erf GELU).
    m = jax.nn.gelu(m)
    m = jnp.dot(m, w2_ref[...], preferred_element_type=jnp.float32) + b2_ref[...]

    o_ref[...] = (x + m).astype(o_ref.dtype)                           # residual 2


# ----------------------------- wrapper ----------------------------------------
def pack_params(params):
    """One-time (offline) parameter repacking: fuse QKV, fold the attention
    scale into the Q columns, stack the four LayerNorm vectors."""
    (ln1_g, ln1_b, wq, bq, wk, bk, wv, bv, wo, bo,
     ln2_g, ln2_b, w1, b1, w2, b2) = params
    scale = jnp.float32(1.0) / jnp.sqrt(jnp.float32(DH))
    wqkv = jnp.concatenate([wq * scale, wk, wv], axis=1)       # (D, 3D)
    bqkv = jnp.concatenate([bq * scale, bk, bv], axis=1)       # (1, 3D)
    ln_p = jnp.concatenate([ln1_g, ln1_b, ln2_g, ln2_b], 0)    # (4, D)
    return (ln_p, wqkv, bqkv, wo, bo, w1, b1, w2, b2)


@jax.jit
def decoder_block(x, packed):
    ln_p, wqkv, bqkv, wo, bo, w1, b1, w2, b2 = packed
    x2d = x.reshape(BS, D)                          # free row-major reshape

    def invariant(r, c):
        # Grid-invariant operand: same block index every step -> no re-DMA.
        # TODO(synk): at production shapes add pipeline_mode=pl.Buffered(1)
        # to single-buffer these and hand the saved VMEM to a bigger row tile.
        return pl.BlockSpec((r, c), lambda b: (0, 0))

    in_specs = [
        pl.BlockSpec((S, D), lambda b: (b, 0)),     # x rows of batch b
        invariant(4, D),          # packed LN params
        invariant(D, 3 * D),      # Wqkv (Q pre-scaled)
        invariant(1, 3 * D),      # bqkv
        invariant(D, D),          # Wo
        invariant(1, D),          # bo
        invariant(D, DFF),        # W1
        invariant(1, DFF),        # b1
        invariant(DFF, D),        # W2
        invariant(1, D),          # b2
    ]

    out2d = pl.pallas_call(
        decoder_block_kernel,
        out_shape=jax.ShapeDtypeStruct((BS, D), x.dtype),
        grid_spec=pltpu.PrefetchScalarGridSpec(
            num_scalar_prefetch=0,
            grid=(B,),                               # one batch per grid step
            in_specs=in_specs,
            out_specs=pl.BlockSpec((S, D), lambda b: (b, 0)),
            scratch_shapes=[pltpu.VMEM((S, D), jnp.float32)],
        ),
        compiler_params=pltpu.CompilerParams(
            # parallel: independent row tiles -> megacore sharding on v7x.
            # At production shapes also set vmem_limit_bytes per generation.
            dimension_semantics=("parallel",)),
    )(x2d, ln_p, wqkv, bqkv, wo, bo, w1, b1, w2, b2)

    return out2d.reshape(B, S, D)


# ----------------------------- pure-JAX reference ------------------------------
def decoder_block_ref(x, params):
    (ln1_g, ln1_b, wq, bq, wk, bk, wv, bv, wo, bo,
     ln2_g, ln2_b, w1, b1, w2, b2) = params

    def ln(v, g, b):
        mu = jnp.mean(v, axis=-1, keepdims=True)
        var = jnp.mean((v - mu) ** 2, axis=-1, keepdims=True)
        return (v - mu) * jax.lax.rsqrt(var + EPS) * g[0] + b[0]

    h = ln(x, ln1_g, ln1_b)
    q = h @ wq + bq[0]
    k = h @ wk + bk[0]
    v = h @ wv + bv[0]
    q = q.reshape(B, S, H, DH).transpose(0, 2, 1, 3)
    k = k.reshape(B, S, H, DH).transpose(0, 2, 1, 3)
    v = v.reshape(B, S, H, DH).transpose(0, 2, 1, 3)
    s = jnp.einsum('bhqd,bhkd->bhqk', q, k) / jnp.sqrt(jnp.float32(DH))
    mask = jnp.tril(jnp.ones((S, S), bool))
    s = jnp.where(mask[None, None], s, -1e30)
    p = jax.nn.softmax(s, axis=-1)
    a = jnp.einsum('bhqk,bhkd->bhqd', p, v).transpose(0, 2, 1, 3).reshape(B, S, D)
    x = x + (a @ wo + bo[0])
    h2 = ln(x, ln2_g, ln2_b)
    m = jax.nn.gelu(h2 @ w1 + b1[0]) @ w2 + b2[0]
    return x + m


# ----------------------------- main --------------------------------------------
if __name__ == "__main__":
    key = jax.random.PRNGKey(0)
    keys = jax.random.split(key, 16)

    def mat(k, r, c, scale):
        return jax.random.normal(k, (r, c), jnp.float32) * scale

    params = (
        jnp.ones((1, D), jnp.float32),                                 # ln1 gamma
        jnp.zeros((1, D), jnp.float32),                                # ln1 beta
        mat(keys[0], D, D, 0.05), jnp.zeros((1, D), jnp.float32),      # Wq, bq
        mat(keys[1], D, D, 0.05), jnp.zeros((1, D), jnp.float32),      # Wk, bk
        mat(keys[2], D, D, 0.05), jnp.zeros((1, D), jnp.float32),      # Wv, bv
        mat(keys[3], D, D, 0.05), jnp.zeros((1, D), jnp.float32),      # Wo, bo
        jnp.ones((1, D), jnp.float32),                                 # ln2 gamma
        jnp.zeros((1, D), jnp.float32),                                # ln2 beta
        mat(keys[4], D, DFF, 0.05), jnp.zeros((1, DFF), jnp.float32),  # W1, b1
        mat(keys[5], DFF, D, 0.05), jnp.zeros((1, D), jnp.float32),    # W2, b2
    )

    x = jax.random.normal(keys[6], (B, S, D), jnp.float32)

    packed = pack_params(params)                 # one-time weight repacking
    out = decoder_block(x, packed)
    out = jax.block_until_ready(out)

    ref = decoder_block_ref(x, params)
    assert out.shape == (B, S, D) and out.dtype == jnp.float32
    assert jnp.allclose(out, ref, atol=1e-4, rtol=1e-4), \
        f"max abs err = {jnp.max(jnp.abs(out - ref))}"

    print("KERNEL_OK")
</pallas_src>

<mosaic_0001>
module attributes {stable_mosaic.version = 11 : i64} {
  func.func @decoder_block_kernel(%arg0: i32, %arg1: memref<8x32xf32, #tpu.memory_space<vmem>>, %arg2: memref<4x32xf32, #tpu.memory_space<vmem>>, %arg3: memref<32x96xf32, #tpu.memory_space<vmem>>, %arg4: memref<1x96xf32, #tpu.memory_space<vmem>>, %arg5: memref<32x32xf32, #tpu.memory_space<vmem>>, %arg6: memref<1x32xf32, #tpu.memory_space<vmem>>, %arg7: memref<32x64xf32, #tpu.memory_space<vmem>>, %arg8: memref<1x64xf32, #tpu.memory_space<vmem>>, %arg9: memref<64x32xf32, #tpu.memory_space<vmem>>, %arg10: memref<1x32xf32, #tpu.memory_space<vmem>>, %arg11: memref<8x32xf32, #tpu.memory_space<vmem>>, %arg12: memref<8x32xf32, #tpu.memory_space<vmem>>) attributes {dimension_semantics = [#tpu.dimension_semantics<parallel>], iteration_bounds = array<i64: 2>, scalar_prefetch = 0 : i64, scratch_operands = 1 : i64, tpu.core_type = #tpu.core_type<tc>, window_params = [{transform_indices = @transform_0, window_bounds = array<i64: 8, 32>}, {pipeline_mode = #tpu.pipeline_mode<synchronous>, transform_indices = @transform_1, window_bounds = array<i64: 4, 32>}, {pipeline_mode = #tpu.pipeline_mode<synchronous>, transform_indices = @transform_2, window_bounds = array<i64: 32, 96>}, {pipeline_mode = #tpu.pipeline_mode<synchronous>, transform_indices = @transform_3, window_bounds = array<i64: 1, 96>}, {pipeline_mode = #tpu.pipeline_mode<synchronous>, transform_indices = @transform_4, window_bounds = array<i64: 32, 32>}, {pipeline_mode = #tpu.pipeline_mode<synchronous>, transform_indices = @transform_5, window_bounds = array<i64: 1, 32>}, {pipeline_mode = #tpu.pipeline_mode<synchronous>, transform_indices = @transform_6, window_bounds = array<i64: 32, 64>}, {pipeline_mode = #tpu.pipeline_mode<synchronous>, transform_indices = @transform_7, window_bounds = array<i64: 1, 64>}, {pipeline_mode = #tpu.pipeline_mode<synchronous>, transform_indices = @transform_8, window_bounds = array<i64: 64, 32>}, {pipeline_mode = #tpu.pipeline_mode<synchronous>, transform_indices = @transform_9, window_bounds = array<i64: 1, 32>}, {transform_indices = @transform_10, window_bounds = array<i64: 8, 32>}]} {
    %c0 = arith.constant 0 : index
    %c0_0 = arith.constant 0 : index
    %0 = vector.load %arg1[%c0, %c0_0] : memref<8x32xf32, #tpu.memory_space<vmem>>, vector<8x32xf32>
    %c0_1 = arith.constant 0 : index
    %c0_2 = arith.constant 0 : index
    %1 = vector.load %arg2[%c0_1, %c0_2] : memref<4x32xf32, #tpu.memory_space<vmem>>, vector<4x32xf32>
    %2 = vector.extract_strided_slice %1 {offsets = [0, 0], sizes = [1, 32], strides = [1, 1]} : vector<4x32xf32> to vector<1x32xf32>
    %3 = vector.shape_cast %2 : vector<1x32xf32> to vector<32xf32>
    %4 = vector.extract_strided_slice %1 {offsets = [1, 0], sizes = [1, 32], strides = [1, 1]} : vector<4x32xf32> to vector<1x32xf32>
    %5 = vector.shape_cast %4 : vector<1x32xf32> to vector<32xf32>
    %cst = arith.constant dense<0.000000e+00> : vector<8xf32>
    %6 = vector.multi_reduction <add>, %0, %cst [1] : vector<8x32xf32> to vector<8xf32>
    %7 = vector.shape_cast %6 : vector<8xf32> to vector<8x1xf32>
    %cst_3 = arith.constant 3.200000e+01 : f32
    %8 = vector.broadcast %cst_3 : f32 to vector<8x1xf32>
    %9 = arith.divf %7, %8 : vector<8x1xf32>
    %10 = vector.broadcast %9 : vector<8x1xf32> to vector<8x32xf32>
    %11 = arith.subf %0, %10 : vector<8x32xf32>
    %12 = vector.broadcast %9 : vector<8x1xf32> to vector<8x32xf32>
    %13 = arith.subf %0, %12 : vector<8x32xf32>
    %14 = arith.mulf %11, %13 : vector<8x32xf32>
    %cst_4 = arith.constant dense<0.000000e+00> : vector<8xf32>
    %15 = vector.multi_reduction <add>, %14, %cst_4 [1] : vector<8x32xf32> to vector<8xf32>
    %16 = vector.shape_cast %15 : vector<8xf32> to vector<8x1xf32>
    %cst_5 = arith.constant 3.200000e+01 : f32
    %17 = vector.broadcast %cst_5 : f32 to vector<8x1xf32>
    %18 = arith.divf %16, %17 : vector<8x1xf32>
    %19 = vector.broadcast %9 : vector<8x1xf32> to vector<8x32xf32>
    %20 = arith.subf %0, %19 : vector<8x32xf32>
    %cst_6 = arith.constant 9.99999974E-6 : f32
    %21 = vector.broadcast %cst_6 : f32 to vector<8x1xf32>
    %22 = arith.addf %18, %21 : vector<8x1xf32>
    %23 = math.rsqrt %22 : vector<8x1xf32>
    %24 = vector.broadcast %23 : vector<8x1xf32> to vector<8x32xf32>
    %25 = arith.mulf %20, %24 : vector<8x32xf32>
    %26 = vector.shape_cast %3 : vector<32xf32> to vector<1x32xf32>
    %27 = vector.broadcast %26 : vector<1x32xf32> to vector<8x32xf32>
    %28 = arith.mulf %25, %27 : vector<8x32xf32>
    %29 = vector.shape_cast %5 : vector<32xf32> to vector<1x32xf32>
    %30 = vector.broadcast %29 : vector<1x32xf32> to vector<8x32xf32>
    %31 = arith.addf %28, %30 : vector<8x32xf32>
    %c0_7 = arith.constant 0 : index
    %c0_8 = arith.constant 0 : index
    %32 = vector.load %arg3[%c0_7, %c0_8] : memref<32x96xf32, #tpu.memory_space<vmem>>, vector<32x96xf32>
    %cst_9 = arith.constant dense<0.000000e+00> : vector<8x96xf32>
    %33 = tpu.matmul %31, %32, %cst_9 {dimension_numbers = #tpu.dot_dimension_numbers<[1], [0], [0], [1], [0, 0, 1, 1], [], []>} : vector<8x32xf32>, vector<32x96xf32>, vector<8x96xf32> -> vector<8x96xf32>
    %c0_10 = arith.constant 0 : index
    %c0_11 = arith.constant 0 : index
    %34 = vector.load %arg4[%c0_10, %c0_11] : memref<1x96xf32, #tpu.memory_space<vmem>>, vector<1x96xf32>
    %35 = vector.broadcast %34 : vector<1x96xf32> to vector<8x96xf32>
    %36 = arith.addf %33, %35 : vector<8x96xf32>
    %37 = tpu.iota {dimensions = array<i32: 0>} : vector<8x8xi32>
    %38 = tpu.iota {dimensions = array<i32: 1>} : vector<8x8xi32>
    %39 = arith.cmpi sle, %38, %37 : vector<8x8xi32>
    %40 = vector.extract_strided_slice %36 {offsets = [0, 0], sizes = [8, 8], strides = [1, 1]} : vector<8x96xf32> to vector<8x8xf32>
    %41 = vector.extract_strided_slice %36 {offsets = [0, 32], sizes = [8, 8], strides = [1, 1]} : vector<8x96xf32> to vector<8x8xf32>
    %42 = vector.extract_strided_slice %36 {offsets = [0, 64], sizes = [8, 8], strides = [1, 1]} : vector<8x96xf32> to vector<8x8xf32>
    "tpu.trace_start"() <{level = 10 : i32, message = "qd,kd->qk"}> : () -> ()
    %cst_12 = arith.constant dense<0.000000e+00> : vector<8x8xf32>
    %43 = tpu.matmul %40, %41, %cst_12 {dimension_numbers = #tpu.dot_dimension_numbers<[1], [1], [0], [0], [0, 0, 1, 0], [], []>} : vector<8x8xf32>, vector<8x8xf32>, vector<8x8xf32> -> vector<8x8xf32>
    %cst_13 = arith.constant -1.000000e+30 : f32
    "tpu.trace_stop"() : () -> ()
    %44 = vector.broadcast %cst_13 : f32 to vector<8x8xf32>
    %45 = arith.select %39, %43, %44 : vector<8x8xi1>, vector<8x8xf32>
    %cst_14 = arith.constant dense<0xFF800000> : vector<8xf32>
    %46 = vector.multi_reduction <maximumf>, %45, %cst_14 [1] : vector<8x8xf32> to vector<8xf32>
    %47 = vector.shape_cast %46 : vector<8xf32> to vector<8x1xf32>
    %48 = vector.broadcast %47 : vector<8x1xf32> to vector<8x8xf32>
    %49 = arith.subf %45, %48 : vector<8x8xf32>
    %50 = math.exp %49 : vector<8x8xf32>
    %cst_15 = arith.constant dense<0.000000e+00> : vector<8xf32>
    %51 = vector.multi_reduction <add>, %50, %cst_15 [1] : vector<8x8xf32> to vector<8xf32>
    %52 = vector.shape_cast %51 : vector<8xf32> to vector<8x1xf32>
    %cst_16 = arith.constant dense<0.000000e+00> : vector<8x8xf32>
    %53 = tpu.matmul %50, %42, %cst_16 {dimension_numbers = #tpu.dot_dimension_numbers<[1], [0], [0], [1], [0, 0, 1, 1], [], []>} : vector<8x8xf32>, vector<8x8xf32>, vector<8x8xf32> -> vector<8x8xf32>
    %54 = tpu.reciprocal %52 : vector<8x1xf32> -> vector<8x1xf32>
    %55 = vector.broadcast %54 : vector<8x1xf32> to vector<8x8xf32>
    %56 = arith.mulf %53, %55 : vector<8x8xf32>
    %c0_17 = arith.constant 0 : index
    %c0_18 = arith.constant 0 : index
    %57 = vector.load %arg12[%c0_17, %c0_18] : memref<8x32xf32, #tpu.memory_space<vmem>>, vector<8x8xf32>
    tpu.vector_store %arg12[%c0_17, %c0_18], %56 {strides = array<i32>} : memref<8x32xf32, #tpu.memory_space<vmem>>, vector<8x8xf32>,
    %58 = vector.extract_strided_slice %36 {offsets = [0, 8], sizes = [8, 8], strides = [1, 1]} : vector<8x96xf32> to vector<8x8xf32>
    %59 = vector.extract_strided_slice %36 {offsets = [0, 40], sizes = [8, 8], strides = [1, 1]} : vector<8x96xf32> to vector<8x8xf32>
    %60 = vector.extract_strided_slice %36 {offsets = [0, 72], sizes = [8, 8], strides = [1, 1]} : vector<8x96xf32> to vector<8x8xf32>
    "tpu.trace_start"() <{level = 10 : i32, message = "qd,kd->qk"}> : () -> ()
    %cst_19 = arith.constant dense<0.000000e+00> : vector<8x8xf32>
    %61 = tpu.matmul %58, %59, %cst_19 {dimension_numbers = #tpu.dot_dimension_numbers<[1], [1], [0], [0], [0, 0, 1, 0], [], []>} : vector<8x8xf32>, vector<8x8xf32>, vector<8x8xf32> -> vector<8x8xf32>
    %cst_20 = arith.constant -1.000000e+30 : f32
    "tpu.trace_stop"() : () -> ()
    %62 = vector.broadcast %cst_20 : f32 to vector<8x8xf32>
    %63 = arith.select %39, %61, %62 : vector<8x8xi1>, vector<8x8xf32>
    %cst_21 = arith.constant dense<0xFF800000> : vector<8xf32>
    %64 = vector.multi_reduction <maximumf>, %63, %cst_21 [1] : vector<8x8xf32> to vector<8xf32>
    %65 = vector.shape_cast %64 : vector<8xf32> to vector<8x1xf32>
    %66 = vector.broadcast %65 : vector<8x1xf32> to vector<8x8xf32>
    %67 = arith.subf %63, %66 : vector<8x8xf32>
    %68 = math.exp %67 : vector<8x8xf32>
    %cst_22 = arith.constant dense<0.000000e+00> : vector<8xf32>
    %69 = vector.multi_reduction <add>, %68, %cst_22 [1] : vector<8x8xf32> to vector<8xf32>
    %70 = vector.shape_cast %69 : vector<8xf32> to vector<8x1xf32>
    %cst_23 = arith.constant dense<0.000000e+00> : vector<8x8xf32>
    %71 = tpu.matmul %68, %60, %cst_23 {dimension_numbers = #tpu.dot_dimension_numbers<[1], [0], [0], [1], [0, 0, 1, 1], [], []>} : vector<8x8xf32>, vector<8x8xf32>, vector<8x8xf32> -> vector<8x8xf32>
    %72 = tpu.reciprocal %70 : vector<8x1xf32> -> vector<8x1xf32>
    %73 = vector.broadcast %72 : vector<8x1xf32> to vector<8x8xf32>
    %74 = arith.mulf %71, %73 : vector<8x8xf32>
    %c0_24 = arith.constant 0 : index
    %c8 = arith.constant 8 : index
    %75 = vector.load %arg12[%c0_24, %c8] : memref<8x32xf32, #tpu.memory_space<vmem>>, vector<8x8xf32>
    tpu.vector_store %arg12[%c0_24, %c8], %74 {strides = array<i32>} : memref<8x32xf32, #tpu.memory_space<vmem>>, vector<8x8xf32>,
    %76 = vector.extract_strided_slice %36 {offsets = [0, 16], sizes = [8, 8], strides = [1, 1]} : vector<8x96xf32> to vector<8x8xf32>
    %77 = vector.extract_strided_slice %36 {offsets = [0, 48], sizes = [8, 8], strides = [1, 1]} : vector<8x96xf32> to vector<8x8xf32>
    %78 = vector.extract_strided_slice %36 {offsets = [0, 80], sizes = [8, 8], strides = [1, 1]} : vector<8x96xf32> to vector<8x8xf32>
    "tpu.trace_start"() <{level = 10 : i32, message = "qd,kd->qk"}> : () -> ()
    %cst_25 = arith.constant dense<0.000000e+00> : vector<8x8xf32>
    %79 = tpu.matmul %76, %77, %cst_25 {dimension_numbers = #tpu.dot_dimension_numbers<[1], [1], [0], [0], [0, 0, 1, 0], [], []>} : vector<8x8xf32>, vector<8x8xf32>, vector<8x8xf32> -> vector<8x8xf32>
    %cst_26 = arith.constant -1.000000e+30 : f32
    "tpu.trace_stop"() : () -> ()
    %80 = vector.broadcast %cst_26 : f32 to vector<8x8xf32>
    %81 = arith.select %39, %79, %80 : vector<8x8xi1>, vector<8x8xf32>
    %cst_27 = arith.constant dense<0xFF800000> : vector<8xf32>
    %82 = vector.multi_reduction <maximumf>, %81, %cst_27 [1] : vector<8x8xf32> to vector<8xf32>
    %83 = vector.shape_cast %82 : vector<8xf32> to vector<8x1xf32>
    %84 = vector.broadcast %83 : vector<8x1xf32> to vector<8x8xf32>
    %85 = arith.subf %81, %84 : vector<8x8xf32>
    %86 = math.exp %85 : vector<8x8xf32>
    %cst_28 = arith.constant dense<0.000000e+00> : vector<8xf32>
    %87 = vector.multi_reduction <add>, %86, %cst_28 [1] : vector<8x8xf32> to vector<8xf32>
    %88 = vector.shape_cast %87 : vector<8xf32> to vector<8x1xf32>
    %cst_29 = arith.constant dense<0.000000e+00> : vector<8x8xf32>
    %89 = tpu.matmul %86, %78, %cst_29 {dimension_numbers = #tpu.dot_dimension_numbers<[1], [0], [0], [1], [0, 0, 1, 1], [], []>} : vector<8x8xf32>, vector<8x8xf32>, vector<8x8xf32> -> vector<8x8xf32>
    %90 = tpu.reciprocal %88 : vector<8x1xf32> -> vector<8x1xf32>
    %91 = vector.broadcast %90 : vector<8x1xf32> to vector<8x8xf32>
    %92 = arith.mulf %89, %91 : vector<8x8xf32>
    %c0_30 = arith.constant 0 : index
    %c16 = arith.constant 16 : index
    %93 = vector.load %arg12[%c0_30, %c16] : memref<8x32xf32, #tpu.memory_space<vmem>>, vector<8x8xf32>
    tpu.vector_store %arg12[%c0_30, %c16], %92 {strides = array<i32>} : memref<8x32xf32, #tpu.memory_space<vmem>>, vector<8x8xf32>,
    %94 = vector.extract_strided_slice %36 {offsets = [0, 24], sizes = [8, 8], strides = [1, 1]} : vector<8x96xf32> to vector<8x8xf32>
    %95 = vector.extract_strided_slice %36 {offsets = [0, 56], sizes = [8, 8], strides = [1, 1]} : vector<8x96xf32> to vector<8x8xf32>
    %96 = vector.extract_strided_slice %36 {offsets = [0, 88], sizes = [8, 8], strides = [1, 1]} : vector<8x96xf32> to vector<8x8xf32>
    "tpu.trace_start"() <{level = 10 : i32, message = "qd,kd->qk"}> : () -> ()
    %cst_31 = arith.constant dense<0.000000e+00> : vector<8x8xf32>
    %97 = tpu.matmul %94, %95, %cst_31 {dimension_numbers = #tpu.dot_dimension_numbers<[1], [1], [0], [0], [0, 0, 1, 0], [], []>} : vector<8x8xf32>, vector<8x8xf32>, vector<8x8xf32> -> vector<8x8xf32>
    %cst_32 = arith.constant -1.000000e+30 : f32
    "tpu.trace_stop"() : () -> ()
    %98 = vector.broadcast %cst_32 : f32 to vector<8x8xf32>
    %99 = arith.select %39, %97, %98 : vector<8x8xi1>, vector<8x8xf32>
    %cst_33 = arith.constant dense<0xFF800000> : vector<8xf32>
    %100 = vector.multi_reduction <maximumf>, %99, %cst_33 [1] : vector<8x8xf32> to vector<8xf32>
    %101 = vector.shape_cast %100 : vector<8xf32> to vector<8x1xf32>
    %102 = vector.broadcast %101 : vector<8x1xf32> to vector<8x8xf32>
    %103 = arith.subf %99, %102 : vector<8x8xf32>
    %104 = math.exp %103 : vector<8x8xf32>
    %cst_34 = arith.constant dense<0.000000e+00> : vector<8xf32>
    %105 = vector.multi_reduction <add>, %104, %cst_34 [1] : vector<8x8xf32> to vector<8xf32>
    %106 = vector.shape_cast %105 : vector<8xf32> to vector<8x1xf32>
    %cst_35 = arith.constant dense<0.000000e+00> : vector<8x8xf32>
    %107 = tpu.matmul %104, %96, %cst_35 {dimension_numbers = #tpu.dot_dimension_numbers<[1], [0], [0], [1], [0, 0, 1, 1], [], []>} : vector<8x8xf32>, vector<8x8xf32>, vector<8x8xf32> -> vector<8x8xf32>
    %108 = tpu.reciprocal %106 : vector<8x1xf32> -> vector<8x1xf32>
    %109 = vector.broadcast %108 : vector<8x1xf32> to vector<8x8xf32>
    %110 = arith.mulf %107, %109 : vector<8x8xf32>
    %c0_36 = arith.constant 0 : index
    %c24 = arith.constant 24 : index
    %111 = vector.load %arg12[%c0_36, %c24] : memref<8x32xf32, #tpu.memory_space<vmem>>, vector<8x8xf32>
    tpu.vector_store %arg12[%c0_36, %c24], %110 {strides = array<i32>} : memref<8x32xf32, #tpu.memory_space<vmem>>, vector<8x8xf32>,
    %c0_37 = arith.constant 0 : index
    %c0_38 = arith.constant 0 : index
    %112 = vector.load %arg12[%c0_37, %c0_38] : memref<8x32xf32, #tpu.memory_space<vmem>>, vector<8x32xf32>
    %c0_39 = arith.constant 0 : index
    %c0_40 = arith.constant 0 : index
    %113 = vector.load %arg5[%c0_39, %c0_40] : memref<32x32xf32, #tpu.memory_space<vmem>>, vector<32x32xf32>
    %cst_41 = arith.constant dense<0.000000e+00> : vector<8x32xf32>
    %114 = tpu.matmul %112, %113, %cst_41 {dimension_numbers = #tpu.dot_dimension_numbers<[1], [0], [0], [1], [0, 0, 1, 1], [], []>} : vector<8x32xf32>, vector<32x32xf32>, vector<8x32xf32> -> vector<8x32xf32>
    %115 = arith.addf %0, %114 : vector<8x32xf32>
    %c0_42 = arith.constant 0 : index
    %c0_43 = arith.constant 0 : index
    %116 = vector.load %arg6[%c0_42, %c0_43] : memref<1x32xf32, #tpu.memory_space<vmem>>, vector<1x32xf32>
    %117 = vector.broadcast %116 : vector<1x32xf32> to vector<8x32xf32>
    %118 = arith.addf %115, %117 : vector<8x32xf32>
    %119 = vector.extract_strided_slice %1 {offsets = [2, 0], sizes = [1, 32], strides = [1, 1]} : vector<4x32xf32> to vector<1x32xf32>
    %120 = vector.shape_cast %119 : vector<1x32xf32> to vector<32xf32>
    %121 = vector.extract_strided_slice %1 {offsets = [3, 0], sizes = [1, 32], strides = [1, 1]} : vector<4x32xf32> to vector<1x32xf32>
    %122 = vector.shape_cast %121 : vector<1x32xf32> to vector<32xf32>
    %cst_44 = arith.constant dense<0.000000e+00> : vector<8xf32>
    %123 = vector.multi_reduction <add>, %118, %cst_44 [1] : vector<8x32xf32> to vector<8xf32>
    %124 = vector.shape_cast %123 : vector<8xf32> to vector<8x1xf32>
    %cst_45 = arith.constant 3.200000e+01 : f32
    %125 = vector.broadcast %cst_45 : f32 to vector<8x1xf32>
    %126 = arith.divf %124, %125 : vector<8x1xf32>
    %127 = vector.broadcast %126 : vector<8x1xf32> to vector<8x32xf32>
    %128 = arith.subf %118, %127 : vector<8x32xf32>
    %129 = vector.broadcast %126 : vector<8x1xf32> to vector<8x32xf32>
    %130 = arith.subf %118, %129 : vector<8x32xf32>
    %131 = arith.mulf %128, %130 : vector<8x32xf32>
    %cst_46 = arith.constant dense<0.000000e+00> : vector<8xf32>
    %132 = vector.multi_reduction <add>, %131, %cst_46 [1] : vector<8x32xf32> to vector<8xf32>
    %133 = vector.shape_cast %132 : vector<8xf32> to vector<8x1xf32>
    %cst_47 = arith.constant 3.200000e+01 : f32
    %134 = vector.broadcast %cst_47 : f32 to vector<8x1xf32>
    %135 = arith.divf %133, %134 : vector<8x1xf32>
    %136 = vector.broadcast %126 : vector<8x1xf32> to vector<8x32xf32>
    %137 = arith.subf %118, %136 : vector<8x32xf32>
    %cst_48 = arith.constant 9.99999974E-6 : f32
    %138 = vector.broadcast %cst_48 : f32 to vector<8x1xf32>
    %139 = arith.addf %135, %138 : vector<8x1xf32>
    %140 = math.rsqrt %139 : vector<8x1xf32>
    %141 = vector.broadcast %140 : vector<8x1xf32> to vector<8x32xf32>
    %142 = arith.mulf %137, %141 : vector<8x32xf32>
    %143 = vector.shape_cast %120 : vector<32xf32> to vector<1x32xf32>
    %144 = vector.broadcast %143 : vector<1x32xf32> to vector<8x32xf32>
    %145 = arith.mulf %142, %144 : vector<8x32xf32>
    %146 = vector.shape_cast %122 : vector<32xf32> to vector<1x32xf32>
    %147 = vector.broadcast %146 : vector<1x32xf32> to vector<8x32xf32>
    %148 = arith.addf %145, %147 : vector<8x32xf32>
    %c0_49 = arith.constant 0 : index
    %c0_50 = arith.constant 0 : index
    %149 = vector.load %arg7[%c0_49, %c0_50] : memref<32x64xf32, #tpu.memory_space<vmem>>, vector<32x64xf32>
    %cst_51 = arith.constant dense<0.000000e+00> : vector<8x64xf32>
    %150 = tpu.matmul %148, %149, %cst_51 {dimension_numbers = #tpu.dot_dimension_numbers<[1], [0], [0], [1], [0, 0, 1, 1], [], []>} : vector<8x32xf32>, vector<32x64xf32>, vector<8x64xf32> -> vector<8x64xf32>
    %c0_52 = arith.constant 0 : index
    %c0_53 = arith.constant 0 : index
    %151 = vector.load %arg8[%c0_52, %c0_53] : memref<1x64xf32, #tpu.memory_space<vmem>>, vector<1x64xf32>
    %152 = vector.broadcast %151 : vector<1x64xf32> to vector<8x64xf32>
    %153 = arith.addf %150, %152 : vector<8x64xf32>
    %154 = arith.mulf %153, %153 : vector<8x64xf32>
    %155 = arith.mulf %153, %154 : vector<8x64xf32>
    %cst_54 = arith.constant 4.471500e-02 : f32
    %156 = vector.broadcast %cst_54 : f32 to vector<8x64xf32>
    %157 = arith.mulf %156, %155 : vector<8x64xf32>
    %158 = arith.addf %153, %157 : vector<8x64xf32>
    %cst_55 = arith.constant 0.797884583 : f32
    %159 = vector.broadcast %cst_55 : f32 to vector<8x64xf32>
    %160 = arith.mulf %159, %158 : vector<8x64xf32>
    %161 = math.tanh %160 : vector<8x64xf32>
    %cst_56 = arith.constant 1.000000e+00 : f32
    %162 = vector.broadcast %cst_56 : f32 to vector<8x64xf32>
    %163 = arith.addf %162, %161 : vector<8x64xf32>
    %cst_57 = arith.constant 5.000000e-01 : f32
    %164 = vector.broadcast %cst_57 : f32 to vector<8x64xf32>
    %165 = arith.mulf %164, %163 : vector<8x64xf32>
    %166 = arith.mulf %153, %165 : vector<8x64xf32>
    %c0_58 = arith.constant 0 : index
    %c0_59 = arith.constant 0 : index
    %167 = vector.load %arg9[%c0_58, %c0_59] : memref<64x32xf32, #tpu.memory_space<vmem>>, vector<64x32xf32>
    %cst_60 = arith.constant dense<0.000000e+00> : vector<8x32xf32>
    %168 = tpu.matmul %166, %167, %cst_60 {dimension_numbers = #tpu.dot_dimension_numbers<[1], [0], [0], [1], [0, 0, 1, 1], [], []>} : vector<8x64xf32>, vector<64x32xf32>, vector<8x32xf32> -> vector<8x32xf32>
    %c0_61 = arith.constant 0 : index
    %c0_62 = arith.constant 0 : index
    %169 = vector.load %arg10[%c0_61, %c0_62] : memref<1x32xf32, #tpu.memory_space<vmem>>, vector<1x32xf32>
    %170 = vector.broadcast %169 : vector<1x32xf32> to vector<8x32xf32>
    %171 = arith.addf %168, %170 : vector<8x32xf32>
    %172 = arith.addf %118, %171 : vector<8x32xf32>
    %c0_63 = arith.constant 0 : index
    %c0_64 = arith.constant 0 : index
    %173 = vector.load %arg11[%c0_63, %c0_64] : memref<8x32xf32, #tpu.memory_space<vmem>>, vector<8x32xf32>
    tpu.vector_store %arg11[%c0_63, %c0_64], %172 {strides = array<i32>} : memref<8x32xf32, #tpu.memory_space<vmem>>, vector<8x32xf32>,
    return
  }
  func.func @transform_0(%arg0: i32) -> (i32, i32) {
    %c0_i32 = arith.constant 0 : i32
    %c0_i32_0 = arith.constant 0 : i32
    return %arg0, %c0_i32 : i32, i32
  }
  func.func @transform_1(%arg0: i32) -> (i32, i32) {
    %c0_i32 = arith.constant 0 : i32
    %c0_i32_0 = arith.constant 0 : i32
    %c0_i32_1 = arith.constant 0 : i32
    return %c0_i32, %c0_i32_0 : i32, i32
  }
  func.func @transform_2(%arg0: i32) -> (i32, i32) {
    %c0_i32 = arith.constant 0 : i32
    %c0_i32_0 = arith.constant 0 : i32
    %c0_i32_1 = arith.constant 0 : i32
    return %c0_i32, %c0_i32_0 : i32, i32
  }
  func.func @transform_3(%arg0: i32) -> (i32, i32) {
    %c0_i32 = arith.constant 0 : i32
    %c0_i32_0 = arith.constant 0 : i32
    %c0_i32_1 = arith.constant 0 : i32
    return %c0_i32, %c0_i32_0 : i32, i32
  }
  func.func @transform_4(%arg0: i32) -> (i32, i32) {
    %c0_i32 = arith.constant 0 : i32
    %c0_i32_0 = arith.constant 0 : i32
    %c0_i32_1 = arith.constant 0 : i32
    return %c0_i32, %c0_i32_0 : i32, i32
  }
  func.func @transform_5(%arg0: i32) -> (i32, i32) {
    %c0_i32 = arith.constant 0 : i32
    %c0_i32_0 = arith.constant 0 : i32
    %c0_i32_1 = arith.constant 0 : i32
    return %c0_i32, %c0_i32_0 : i32, i32
  }
  func.func @transform_6(%arg0: i32) -> (i32, i32) {
    %c0_i32 = arith.constant 0 : i32
    %c0_i32_0 = arith.constant 0 : i32
    %c0_i32_1 = arith.constant 0 : i32
    return %c0_i32, %c0_i32_0 : i32, i32
  }
  func.func @transform_7(%arg0: i32) -> (i32, i32) {
    %c0_i32 = arith.constant 0 : i32
    %c0_i32_0 = arith.constant 0 : i32
    %c0_i32_1 = arith.constant 0 : i32
    return %c0_i32, %c0_i32_0 : i32, i32
  }
  func.func @transform_8(%arg0: i32) -> (i32, i32) {
    %c0_i32 = arith.constant 0 : i32
    %c0_i32_0 = arith.constant 0 : i32
    %c0_i32_1 = arith.constant 0 : i32
    return %c0_i32, %c0_i32_0 : i32, i32
  }
  func.func @transform_9(%arg0: i32) -> (i32, i32) {
    %c0_i32 = arith.constant 0 : i32
    %c0_i32_0 = arith.constant 0 : i32
    %c0_i32_1 = arith.constant 0 : i32
    return %c0_i32, %c0_i32_0 : i32, i32
  }
  func.func @transform_10(%arg0: i32) -> (i32, i32) {
    %c0_i32 = arith.constant 0 : i32
    %c0_i32_0 = arith.constant 0 : i32
    return %arg0, %c0_i32 : i32, i32
  }
}

</mosaic_0001>

<bundles_post_ra>
// kernel: decoder_block.1
= control target key start
LH: loop header
LB: loop body
LE: loop exit
PB: predicated region body
PF: predicated region fallthrough
CT: control target
= control target key end

     0   :  { %s2402_s0 = inlined_call_operand.hbm [shape: f32[16,32], index: 0, kind: input, shape index: {}]   ;;  %s2403_s1 = inlined_call_operand.hbm [shape: f32[4,32], index: 1, kind: input, shape index: {}]   ;;  %s2404_s2 = inlined_call_operand.vmem [shape: f32[32,96], index: 2, kind: input, shape index: {}]   ;;  %s2405_s3 = inlined_call_operand.vmem [shape: f32[1,96], index: 3, kind: input, shape index: {}]   ;;  %s2406_s4 = inlined_call_operand.vmem [shape: f32[32,32], index: 4, kind: input, shape index: {}]   ;;  %s2407_s5 = inlined_call_operand.vmem [shape: f32[1,32], index: 5, kind: input, shape index: {}]   ;;  %s2408_s6 = inlined_call_operand.vmem [shape: f32[32,64], index: 6, kind: input, shape index: {}]   ;;  %s2409_s7 = inlined_call_operand.vmem [shape: f32[1,64], index: 7, kind: input, shape index: {}]   ;;  %s2410_s8 = inlined_call_operand.vmem [shape: f32[64,32], index: 8, kind: input, shape index: {}]   ;;  %s2411_s9 = inlined_call_operand.vmem [shape: f32[1,32], index: 9, kind: input, shape index: {}]   ;;  %s2412_s10 = inlined_call_operand.hbm [shape: f32[16,32], index: 10, kind: output, shape index: {}]  }
   0x1   :  { %2421 = sst [smem:[#allocation16_spill]] %s2403_s1 }
   0x2   :  { %15 = vsyncpa [#allocation4], 0 }
   0x3   :  { %17 = vsyncpa [#allocation4 + $0x1], 0 }
   0x4   :  { %18 = vsyncpa [#allocation7], 0 }
   0x5   :  { %19 = vsyncpa [#allocation5], 0 }
   0x6   :  { %21 = vsyncpa [#allocation5 + $0x1], 0  ;;  %s2034_s13 = smov 0   ;;  %s2036_s14 = smov 0  }
   0x7   :  { %s2038_s15 = smov 0   ;;  %s2040_s16 = smov 0  }
   0x8 LB: > { %2422 = sst [smem:[#allocation12_spill]] %s1954_s15  ;;  %s2055_s17 = sadd.s32 4294967295, %s1958_s16   ;;  %s1958_s16 = sphi %s2040_s16, %s2443_s16   ;;  %s1954_s15 = sphi %s2038_s15, %s2445_s15   ;;  %s1950_s14 = sphi %s2036_s14, %s2447_s14   ;;  %s1946_s13 = sphi %s2034_s13, %s2446_s13  }
   0x9   : > { %2423 = sst [smem:[#allocation13_spill]] %s1958_s16  ;;  %s1575_s18 = sadd.s32 4294967294, %s1958_s16  }
   0xa   : > { %p47_p0 = scmp.ne.s32.totalorder %s1950_s14, %s1946_s13  ;;  %p2413_p1 = scmp.eq.s32.totalorder %s2055_s17, 0 }
   0xb   : > { %p266_p3 = scmp.eq.s32.totalorder %s1575_s18, 1  ;;  %p1576_p5 = scmp.ge.s32.totalorder %s1958_s16, 1 }
   0xc   : > { %p2064_p4 = por %p2413_p1, %p47_p0  ;;  %p273_p7 = scmp.lt.s32.totalorder %s1958_s16, 3 }
   0xd   : > { %p2069_p6 = por %p266_p3, %p47_p0  ;;  %s1960_s22 = smov [#allocation6]  }
   0xe   : > { %s2424_s19 = scalar_select %p2064_p4, 1, 0 }
   0xf   : > { %s2425_s20 = scalar_select %p2069_p6, 1, 0 }
  0x10   : > { %p2074_p8 = pnand %p1576_p5, %p273_p7  ;;  %s286_s23 = sshll.u32 %s1960_s22, 4  ;;  %s287_s23 = int_to_ptr.vmem [resolvable:$true] %s286_s23 }
  0x11   : > { %s2082_s24 = sadd.s32 1, %s1958_s16   ;;  %s34_s28 = sadd.s32 1, %s1954_s15 }
  0x12   : > { %s2426_s21 = scalar_select %p2074_p8, 1, 0 }
  0x13   : > { %p1749_p10 = pneg %p2074_p8  ;;  %2427 = sst [smem:[#allocation14_spill]] %s2082_s24 }
  0x14   : > { %s31_s26 = ssub.s32 %s1958_s16, %s2082_s24  ;;  %p41_p13 = scmp.ne.s32.totalorder %s1954_s15, %s1950_s14 }
  0x15   : > { %p2086_p11 = pnand %p1749_p10, %p2413_p1  ;;  %p2092_p12 = scmp.eq.s32.totalorder %s31_s26, 0 }
  0x16   : > { %s1847_s29 = scalar_lea.vmem %s287_s23, 64  ;;  %p1855_p9 = scmp.lt.s32.totalorder %s287_s23, %s287_s23 }
  0x17   : > { %p1838_p0 = pneg %p2086_p11  ;;  %p1848_p3 = scmp.ne.s32.totalorder %s287_s23, %s1847_s29 }
  0x18   : > { %p1856_p2 = scmp.lt.s32.totalorder %s1847_s29, %s1847_s29 }
  0x19   : > { %p1850_p5 = pnand %p1848_p3, %p1838_p0 }
  0x1a   : > { %p1857_p10 = por %p1856_p2, %p1855_p9 }
  0x1b   : > { %p1851_p7 = pneg %p1850_p5 }
  0x1d   : > { %p1858_p1 = pnand %p1857_p10, %p1851_p7 }
  0x1f   : > { %1861 = shalt.err (!%p1858_p1)
}
  0x20   : > { %s2430_s1 = sld [smem:[#allocation16_spill]]  ;;  %p42_p1 = scmp.eq.s32.totalorder %s1958_s16, 0 }
  0x21   : > { %s2109_s12 = scalar_select %p2092_p12, %s1954_s15, %s34_s28  }
  0x22   : > { %p2432_p2 = scmp.eq.s32.totalorder %s2055_s17, 1  ;;  %p1762_p0 = scmp.lt.s32.totalorder %s1958_s16, 2 }
  0x23   : > { %2431 = sst [smem:[#allocation15_spill]] %s2109_s12  ;;  %s321_s22 = sand.u32 1, %s1954_s15  }
  0x24   : > { %p2117_p9 = por %p2432_p2, %p41_p13  ;;  %p43_p3 = por %p42_p1, %p41_p13 }
  0x25   : > { %s1579_s25 = sshll.u32 %s321_s22, 3  ;;  %s1580_s26 = sshll.u32 %s1958_s16, 7 }
  0x26   : > { %1752 = dma.hbm_to_vmem [thread:$0]  (!%p2086_p11), %s2430_s1, 64, %s287_s23, [#allocation7]  }
  0x27   : > { %s2433_s18 = scalar_select %p2117_p9, 1, 0 }
  0x28   : > { %s2130_s23 = scalar_lea.hbm %s2402_s0, %s1580_s26  ;;  %s325_s27 = scalar_lea.vmem [#allocation3], %s1579_s25 }
  0x29   : > { %s332_s28 = sshll.u32 %s325_s27, 4  ;;  %p2132_p11 = pnand %p1762_p0, %p43_p3  ;;  %s333_s28 = int_to_ptr.vmem [resolvable:$true] %s332_s28 }
  0x2a   : > { %s322_s1 = scalar_lea.sflag [#allocation4], %s321_s22  ;;  %s1862_s12 = scalar_lea.hbm %s2130_s23, 128 }
  0x2b   : > { %p1863_p12 = scmp.ne.s32.totalorder %s2130_s23, %s1862_s12  ;;  %p1864_p13 = pneg %p2132_p11 }
  0x2c   : > { %s1867_s30 = scalar_lea.hbm %s2402_s0, 256  ;;  %p1868_p10 = scmp.lt.s32.totalorder %s2130_s23, %s2402_s0 }
  0x2d   : > { %p1865_p5 = pnand %p1864_p13, %p1863_p12  ;;  %p1869_p1 = scmp.lt.s32.totalorder %s1867_s30, %s1862_s12 }
  0x2f   : > { %p1866_p7 = pneg %p1865_p5  ;;  %p1870_p2 = por %p1869_p1, %p1868_p10 }
  0x31   : > { %p1871_p0 = pnand %p1870_p2, %p1866_p7 }
  0x33   : > { %1874 = shalt.err (!%p1871_p0)
}
  0x34   : > { %s1875_s27 = scalar_lea.vmem %s333_s28, 128  ;;  %s1961_s22 = smov [#allocation3]  }
  0x35   : > { %p1876_p3 = scmp.ne.s32.totalorder %s333_s28, %s1875_s27  ;;  %s1880_s24 = sshll.u32 %s1961_s22, 4  ;;  %s1881_s24 = int_to_ptr.vmem [resolvable:$false] %s1880_s24 }
  0x36   : > { %s1882_s16 = scalar_lea.vmem %s1881_s24, 256  ;;  %p1883_p12 = scmp.lt.s32.totalorder %s333_s28, %s1881_s24 }
  0x37   : > { %p1878_p6 = pnand %p1876_p3, %p1864_p13  ;;  %p1884_p5 = scmp.lt.s32.totalorder %s1882_s16, %s1875_s27 }
  0x39   : > { %p1879_p9 = pneg %p1878_p6  ;;  %p1885_p4 = por %p1884_p5, %p1883_p12 }
  0x3b   : > { %p1886_p8 = pnand %p1885_p4, %p1879_p9 }
  0x3d   : > { %1889 = shalt.err (!%p1886_p8)
}
  0x3e   : > { %1756 = dma.hbm_to_vmem [thread:$0]  (!%p2132_p11), %s2130_s23, 128, %s333_s28, %s322_s1  }
  0x3f   : > { %p2435_p7 = scmp.ne.s32.totalorder %s2426_s21, 0 }
  0x40   : > { %s2153_s15 = sand.u32 (!%p2435_p7), 1, %s1950_s14   ;;  %p2436_p4 = scmp.ne.s32.totalorder (!%p2435_p7), %s2424_s19, 0 }
  0x41   : > { %341 = sbr.rel (%p2435_p7) target bundleno = 2322 (0x912), region = 60  ;;  %s1582_s12 = sshll.u32 (!%p2435_p7), %s2153_s15, 3 }
  0x42   : > { %s344_s24 = scalar_lea.sflag (!%p2435_p7), [#allocation4], %s2153_s15  ;;  %s347_s16 = scalar_lea.vmem (!%p2435_p7), [#allocation3], %s1582_s12 }
  0x46   : > { %1933 = dma.done.wait (%p2436_p4), %s344_s24, 128  }
  0x47   : > { %1935 = vsyncadd (%p2436_p4), %s344_s24, 4294967168  ;;  %p2437_p6 = scmp.eq.s32.totalorder %s2055_s17, 0 }
  0x49   : > { %1937 = dma.done.wait (%p2437_p6), [#allocation7], 64   ;;  %p2438_p8 = pmov %p2437_p6 }
  0x4a   : > { %vm390_vm0 = vcmask 261120   ;;  %v2167_v0 = vld [vmem:[%s347_s16] sm:$0xff]  ;;  %v418_v7 = vld [vmem:[%s2404_s2 + $0x18] sm:$0xff]  ;;  %v1962_v8 = vmov 0.0   ;;  %vm1963_vm1 = vmmov 0   ;;  %v415_v11 = vld [vmem:[%s2404_s2] sm:$0xff]  ;;  %v405_v15 = vlaneseq }
  0x4b   : > { %1939 = vsyncadd (%p2438_p8), [#allocation7], 4294967232  ;;  %v391_v1 = vsel %vm390_vm0, %v2167_v0, 0.0  ;;  %1649 = vmatprep.subr.mxu1 %v1962_v8  ;;  %v417_v9 = vld [vmem:[%s2404_s2 + $0x10] sm:$0xff]  ;;  %1657 = vmatprep.mubr.msk.f32.mxu1 %vm1963_vm1, %v1962_v8  ;;  %v416_v10 = vld [vmem:[%s2404_s2 + $0x8] sm:$0xff]  ;;  %s1964_s27 = smov 120  }
  0x4c   : > { %392 = vadd.xlane.f32.xlu0 %v391_v1  ;;  %1650 = vmatpush3.msra.mxu1 %v418_v7  ;;  %v2195_v16 = vshrl.u32 %v405_v15, 7  ;;  %v2198_v18 = vld [vmem:[#allocation6] sm:$0xf]  ;;  %v1585_v26 = vld [vmem:[%s2405_s3] ss:$0 sm:$0xff]  ;;  %s1965_s22 = smov 96  }
  0x4d   : > { %1670 = vmatprep.subr.mxu0 %v1962_v8  ;;  %1651 = vmatprep.subr.mxu1 %v1962_v8  ;;  %s1966_s24 = smov 88   ;;  %s1967_s16 = smov 80   ;;  %vm507_vm2 = vcmask 64512   ;;  %v502_v38 = vand.u32 127, %v405_v15  ;;  %vm841_vm4 = vcmask 130112   ;;  %vm1013_vm5 = vcmask 195712  }
  0x4e   : > { %1672 = vmatprep.mubr.msk.f32.mxu0 %vm1963_vm1, %v1962_v8  ;;  %1652 = vmatpush3.msra.mxu1 %v417_v9  ;;  %v407_v17 = vsub.s32 0, %v2195_v16  ;;  %v412_v19 = vsub.s32 1, %v2195_v16  ;;  %s1968_s1 = smov 112   ;;  %s1969_s19 = smov 72   ;;  %vm1185_vm6 = vcmask 261312   ;;  %vm1405_vm7 = vcmask 523264  }
  0x4f   : > { %1653 = vmatprep.subr.mxu1 %v1962_v8  ;;  %s1970_s21 = smov 104   ;;  %s1971_s23 = smov 64   ;;  %vm503_vm3 = vcmp.le.s32.totalorder %v502_v38, %v2195_v16 }
  0x50   : > { %1654 = vmatpush3.msra.mxu1 %v416_v10  ;;  %v408_v20 = vrot.slane %v2198_v18, %v407_v17  ;;  %v413_v23 = vrot.slane %v2198_v18, %v412_v19  ;;  %s1972_s28 = smov 48   ;;  %s1973_s11 = smov 40  }
  0x51   : > { %1655 = vmatprep.subr.mxu1 %v1962_v8  ;;  %s1974_s26 = smov 56   ;;  %s1975_s29 = smov 8  }
  0x52   : > { %1656 = vmatpush3.msra.mxu1 %v415_v11  ;;  %p2439_p11 = scmp.ne.s32.totalorder %s2433_s18, 0 }
  0x53   : > { %1660 = vmatprep.subr.mxu1 %v1962_v8 }
  0xd5   : > { %v393_v2 = vpop.xlane.xlu0 %392 }
  0xd6   : > { %v395_v3 = vmul.f32 0.03125, %v393_v2 }
  0xd8   : > { %v396_v4 = vsub.f32 %v2167_v0, %v395_v3 }
  0xda   : > { %v397_v5 = vmul.f32 %v396_v4, %v396_v4 }
  0xdc   : > { %v398_v6 = vsel %vm390_vm0, %v397_v5, 0.0 }
  0xdd   : > { %399 = vadd.xlane.f32.xlu0 %v398_v6 }
 0x166   : > { %v400_v12 = vpop.xlane.xlu0 %399 }
 0x167   : > { %v401_v13 = vmul.f32 0.03125, %v400_v12 }
 0x169   : > { %v402_v14 = vadd.f32 1e-05, %v401_v13 }
 0x16b   : > { %1814 = vrsqrt.f32 %v402_v14 }
 0x178   : > { %v1815_v21 = vpop.eup %1814 }
 0x179   : > { %v404_v22 = vmul.f32 %v1815_v21, %v396_v4 }
 0x17b   : > { %v409_v24 = vmul.f32 %v408_v20, %v404_v22 }
 0x17d   : > { %v414_v25 = vadd.f32 %v413_v23, %v409_v24 }
 0x17f   : > { %1658 = vmatmul.mubr.msk.f32.vlgmr.msra.gmra.mxu1 %vm390_vm0, %v414_v25 }
 0x180   : > { %1662 = vmatprep.mubr.msk.f32.mxu1 %vm1963_vm1, %v1962_v8 }
 0x23f   : > { %v495_v27 = vpop.f32.mrf.mxu1 }
 0x240   : > { %v2209_v28 = vadd.f32 %v1585_v26, %v495_v27 }
 0x241   : > { %v1659_v29 = vpop.f32.mrf.mxu1 }
 0x242   : > { %671 = vrot.lane.b32.xlu0 %v2209_v28, %s1964_s27  ;;  %505 = vrot.lane.b32.xlu1 %v2209_v28, %s1965_s22 }
 0x246   : > { %673 = vrot.lane.b32.xlu1 %v2209_v28, %s1966_s24  ;;  %s1482_s24 = scalar_lea.sflag [#allocation5], %s2153_s15 }
 0x24a   : > { %845 = vrot.lane.b32.xlu1 %v2209_v28, %s1967_s16 }
 0x24e   : > { %843 = vrot.lane.b32.xlu1 %v2209_v28, %s1968_s1 }
 0x252   : > { %1017 = vrot.lane.b32.xlu1 %v2209_v28, %s1969_s19 }
 0x256   : > { %1015 = vrot.lane.b32.xlu1 %v2209_v28, %s1970_s21  ;;  %s1976_s21 = smov 16  }
 0x25a   : > { %592 = vrot.lane.b32.xlu1 %v2209_v28, %s1971_s23  ;;  %s1977_s23 = smov 24  }
 0x2b4   : > { %v506_v30 = vpop.permute.xlu1 %505  ;;  %v672_v32 = vpop.permute.xlu0 %671 }
 0x2b5   : > { %1661 = vmatpush3.xpose.msk.msra.mxu1 %vm507_vm2, %v506_v30  ;;  %v1191_v30 = vld [vmem:[%s2406_s4 + $0x18] sm:$0xff] }
 0x2b6   : > { %1665 = vmatprep.subr.mxu1 %v1962_v8 }
 0x2b8   : > { %1663 = vmatmul.mubr.msk.f32.vlgmr.msra.gmra.mxu1 %vm507_vm2, %v2209_v28  ;;  %v674_v31 = vpop.permute.xlu1 %673 }
 0x2b9   : > { %1671 = vmatpush3.xpose.msk.msra.mxu0 %vm507_vm2, %v674_v31  ;;  %1667 = vmatprep.mubr.msk.f32.mxu1 %vm1963_vm1, %v1962_v8  ;;  %v1190_v31 = vld [vmem:[%s2406_s4 + $0x10] sm:$0xff] }
 0x2ba   : > { %1680 = vmatprep.subr.mxu0 %v1962_v8 }
 0x2bc   : > { %1673 = vmatmul.mubr.msk.f32.vlgmr.msra.gmra.mxu0 %vm507_vm2, %v672_v32  ;;  %v846_v33 = vpop.permute.xlu1 %845 }
 0x2bd   : > { %1681 = vmatpush3.xpose.msk.msra.mxu0 %vm507_vm2, %v846_v33  ;;  %1682 = vmatprep.mubr.msk.f32.mxu0 %vm1963_vm1, %v1962_v8 }
 0x2be   : > { %1690 = vmatprep.subr.mxu0 %v1962_v8 }
 0x2c0   : > { %v844_v34 = vpop.permute.xlu1 %843 }
 0x2c1   : > { %1683 = vmatmul.mubr.msk.f32.vlgmr.msra.gmra.mxu0 %vm507_vm2, %v844_v34  ;;  %v1189_v34 = vld [vmem:[%s2406_s4 + $0x8] sm:$0xff] }
 0x2c2   : > { %1692 = vmatprep.mubr.msk.f32.mxu0 %vm1963_vm1, %v1962_v8 }
 0x2c4   : > { %v1018_v35 = vpop.permute.xlu1 %1017 }
 0x2c5   : > { %1691 = vmatpush3.xpose.msk.msra.mxu0 %vm507_vm2, %v1018_v35 }
 0x2c6   : > { %1700 = vmatprep.subr.mxu0 %v1962_v8 }
 0x2c8   : > { %v1016_v36 = vpop.permute.xlu1 %1015 }
 0x2c9   : > { %1693 = vmatmul.mubr.msk.f32.vlgmr.msra.gmra.mxu0 %vm507_vm2, %v1016_v36 }
 0x2ca   : > { %1708 = vmatprep.mubr.msk.f32.mxu0 %vm1963_vm1, %v1962_v8  ;;  %1701 = vmatpush3.msra.mxu0 %v1191_v30 }
 0x2cb   : > { %1702 = vmatprep.subr.mxu0 %v1962_v8 }
 0x2cc   : > { %v593_v37 = vpop.permute.xlu1 %592  ;;  %1703 = vmatpush3.msra.mxu0 %v1190_v31 }
 0x2cd   : > { %1666 = vmatpush3.msra.mxu1 %v593_v37  ;;  %1704 = vmatprep.subr.mxu0 %v1962_v8  ;;  %v1188_v37 = vld [vmem:[%s2406_s4] sm:$0xff] }
 0x2ce   : > { %1675 = vmatprep.subr.mxu1 %v1962_v8  ;;  %1705 = vmatpush3.msra.mxu0 %v1189_v34 }
 0x2cf   : > { %1706 = vmatprep.subr.mxu0 %v1962_v8 }
 0x2d0   : > { %1707 = vmatpush3.msra.mxu0 %v1188_v37 }
 0x2d1   : > { %1722 = vmatprep.subr.mxu0 %v1962_v8 }
 0x378   : > { %v578_v39 = vpop.f32.mrf.mxu1 }
 0x379   : > { %v582_v40 = vsel %vm503_vm3, %v578_v39, -1e+30 }
 0x37a   : > { %v1664_v41 = vpop.f32.mrf.mxu1  ;;  %v583_v42 = vsel %vm507_vm2, %v582_v40, -inf }
 0x37b   : > { %584 = vmax.xlane.f32.xlu1 %v583_v42 }
 0x37c   : > { %v745_v43 = vpop.f32.mrf.mxu0 }
 0x37d   : > { %v749_v44 = vsel %vm503_vm3, %v745_v43, -1e+30 }
 0x37e   : > { %v1674_v45 = vpop.f32.mrf.mxu0  ;;  %v750_v46 = vsel %vm507_vm2, %v749_v44, -inf }
 0x37f   : > { %751 = vmax.xlane.f32.xlu0 %v750_v46 }
 0x381   : > { %v917_v47 = vpop.f32.mrf.mxu0 }
 0x382   : > { %v921_v48 = vsel %vm503_vm3, %v917_v47, -1e+30  ;;  %v1600_v47 = vld [vmem:[%s2407_s5] ss:$0 sm:$0xff] }
 0x383   : > { %v1684_v49 = vpop.f32.mrf.mxu0  ;;  %v922_v50 = vsel %vm507_vm2, %v921_v48, -inf }
 0x384   : > { %923 = vmax.xlane.f32.xlu1 %v922_v50 }
 0x389   : > { %v1089_v51 = vpop.f32.mrf.mxu0 }
 0x38a   : > { %v1093_v52 = vsel %vm503_vm3, %v1089_v51, -1e+30 }
 0x38b   : > { %v1694_v53 = vpop.f32.mrf.mxu0  ;;  %v1094_v54 = vsel %vm507_vm2, %v1093_v52, -inf }
 0x38c   : > { %1095 = vmax.xlane.f32.xlu0 %v1094_v54 }
 0x395   : > { %931 = vrot.lane.b32.xlu1 %v2209_v28, %s1972_s28 }
 0x399   : > { %1103 = vrot.lane.b32.xlu1 %v2209_v28, %s1973_s11 }
 0x3a2   : > { %759 = vrot.lane.b32.xlu0 %v2209_v28, %s1974_s26  ;;  %s1606_s26 = sshll.u32 %s2055_s17, 7  ;;  %s1978_s17 = smov [#allocation8]  }
 0x3a3   : > { %s1493_s22 = scalar_lea.hbm %s2412_s10, %s1606_s26 }
 0x404   : > { %v585_v55 = vpop.xlane.xlu1 %584 }
 0x405   : > { %v586_v56 = vsub.f32 %v582_v40, %v585_v55 }
 0x407   : > { %v587_v57 = vmul.f32 1.442695, %v586_v56 }
 0x408   : > { %v752_v58 = vpop.xlane.xlu0 %751 }
 0x409   : > { %1816 = vpow2.f32 %v587_v57  ;;  %v753_v59 = vsub.f32 %v749_v44, %v752_v58  ;;  %v1300_v57 = vld [vmem:[%s2408_s6 + $0x18] sm:$0xff]  ;;  %v1298_v58 = vld [vmem:[%s2408_s6 + $0x8] sm:$0xff] }
 0x40b   : > { %v754_v60 = vmul.f32 1.442695, %v753_v59  ;;  %v1297_v59 = vld [vmem:[%s2408_s6] sm:$0xff] }
 0x40d   : > { %1818 = vpow2.f32 %v754_v60  ;;  %v924_v61 = vpop.xlane.xlu1 %923 }
 0x40e   : > { %v925_v62 = vsub.f32 %v921_v48, %v924_v61 }
 0x410   : > { %v926_v63 = vmul.f32 1.442695, %v925_v62 }
 0x411   : > { %v932_v7 = vpop.permute.xlu1 %931 }
 0x412   : > { %1820 = vpow2.f32 %v926_v63  ;;  %v1289_v63 = vsub.s32 2, %v2195_v16 }
 0x415   : > { %v1096_v1 = vpop.xlane.xlu0 %1095  ;;  %v1104_v11 = vpop.permute.xlu1 %1103 }
 0x416   : > { %v1817_v2 = vpop.eup %1816  ;;  %v1097_v3 = vsub.f32 %v1093_v52, %v1096_v1  ;;  %v1294_v1 = vsub.s32 3, %v2195_v16  ;;  %v1396_v16 = vld [vmem:[%s2410_s8 + $0x30] sm:$0xff] }
 0x417   : > { %1668 = vmatmul.mubr.msk.f32.vlgmr.msra.gmra.mxu1 %vm507_vm2, %v1817_v2  ;;  %v589_v15 = vsel %vm507_vm2, %v1817_v2, 0.0  ;;  %v1290_v2 = vrot.slane %v2198_v18, %v1289_v63 }
 0x418   : > { %v1098_v4 = vmul.f32 1.442695, %v1097_v3  ;;  %1677 = vmatprep.mubr.msk.f32.mxu1 %vm1963_vm1, %v1962_v8 }
 0x419   : > { %v760_v5 = vpop.permute.xlu0 %759 }
 0x41a   : > { %v1819_v6 = vpop.eup %1818  ;;  %1822 = vpow2.f32 %v1098_v4  ;;  %1676 = vmatpush3.msra.mxu1 %v760_v5  ;;  %v1295_v5 = vrot.slane %v2198_v18, %v1294_v1  ;;  %v1395_v18 = vld [vmem:[%s2410_s8 + $0x28] sm:$0xff] }
 0x41b   : > { %1678 = vmatmul.mubr.msk.f32.vlgmr.msra.gmra.mxu1 %vm507_vm2, %v1819_v6  ;;  %1685 = vmatprep.subr.mxu1 %v1962_v8  ;;  %v756_v9 = vsel %vm507_vm2, %v1819_v6, 0.0 }
 0x41c   : > { %757 = vadd.xlane.f32.xlu0 %v756_v9  ;;  %1686 = vmatpush3.msra.mxu1 %v932_v7  ;;  %v1397_v9 = vld [vmem:[%s2410_s8 + $0x38] sm:$0xff] }
 0x41d   : > { %1687 = vmatprep.mubr.msk.f32.mxu1 %vm1963_vm1, %v1962_v8  ;;  %1695 = vmatprep.subr.mxu1 %v1962_v8 }
 0x41f   : > { %v1821_v10 = vpop.eup %1820 }
 0x420   : > { %1688 = vmatmul.mubr.msk.f32.vlgmr.msra.gmra.mxu1 %vm507_vm2, %v1821_v10  ;;  %v928_v12 = vsel %vm507_vm2, %v1821_v10, 0.0  ;;  %v1394_v10 = vld [vmem:[%s2410_s8 + $0x20] sm:$0xff] }
 0x421   : > { %1696 = vmatpush3.msra.mxu1 %v1104_v11  ;;  %929 = vadd.xlane.f32.xlu1 %v928_v12  ;;  %v1393_v11 = vld [vmem:[%s2410_s8 + $0x18] sm:$0xff]  ;;  %v1392_v12 = vld [vmem:[%s2410_s8 + $0x10] sm:$0xff] }
 0x422   : > { %1697 = vmatprep.mubr.msk.f32.mxu1 %vm1963_vm1, %v1962_v8  ;;  %1711 = vmatprep.subr.mxu1 %v1962_v8 }
 0x427   : > { %v1823_v13 = vpop.eup %1822 }
 0x428   : > { %1698 = vmatmul.mubr.msk.f32.vlgmr.msra.gmra.mxu1 %vm507_vm2, %v1823_v13  ;;  %v1100_v14 = vsel %vm507_vm2, %v1823_v13, 0.0  ;;  %v1391_v13 = vld [vmem:[%s2410_s8 + $0x8] sm:$0xff] }
 0x429   : > { %1101 = vadd.xlane.f32.xlu0 %v1100_v14  ;;  %1719 = vmatprep.mubr.msk.f32.mxu1 %vm1963_vm1, %v1962_v8  ;;  %v1390_v14 = vld [vmem:[%s2410_s8] sm:$0xff] }
 0x42a   : > { %1712 = vmatpush3.msra.mxu1 %v1300_v57 }
 0x42b   : > { %1713 = vmatprep.subr.mxu1 %v1962_v8 }
 0x42d   : > { %590 = vadd.xlane.f32.xlu0 %v589_v15  ;;  %v1601_v15 = vld [vmem:[%s2409_s7] ss:$0 sm:$0xff] }
 0x4a5   : > { %v758_v17 = vpop.xlane.xlu0 %757 }
 0x4aa   : > { %v930_v21 = vpop.xlane.xlu1 %929 }
 0x4b2   : > { %v1102_v19 = vpop.xlane.xlu0 %1101 }
 0x4b6   : > { %v591_v20 = vpop.xlane.xlu0 %590 }
 0x4b7   : > { %1824 = vrcp.f32 %v591_v20 }
 0x4b8   : > { %1826 = vrcp.f32 %v758_v17 }
 0x4b9   : > { %1828 = vrcp.f32 %v930_v21 }
 0x4ba   : > { %1830 = vrcp.f32 %v1102_v19 }
 0x4c4   : > { %v1825_v22 = vpop.eup %1824 }
 0x4c5   : > { %v1827_v26 = vpop.eup %1826 }
 0x4c6   : > { %v1829_v32 = vpop.eup %1828 }
 0x4c7   : > { %v1831_v38 = vpop.eup %1830 }
 0x4d7   : > { %v664_v23 = vpop.f32.mrf.mxu1 }
 0x4d8   : > { %v669_v24 = vmul.f32 %v1825_v22, %v664_v23 }
 0x4d9   : > { %v1669_v25 = vpop.f32.mrf.mxu1 }
 0x4da   : > { %670 = vst.msk [vmem:[#allocation2] sm:$0xff] %vm507_vm2, %v669_v24 }
 0x4db   : > { %v831_v27 = vpop.f32.mrf.mxu1 }
 0x4dc   : > { %v836_v28 = vmul.f32 %v1827_v26, %v831_v27 }
 0x4dd   : > { %v1679_v29 = vpop.f32.mrf.mxu1 }
 0x4de   : > { %838 = vrot.lane.b32.xlu1 %v836_v28, %s1975_s29  ;;  %v1603_v29 = vld [vmem:[%s2411_s9] ss:$0 sm:$0xff]  ;;  %s387_s29 = scalar_lea.vmem [#allocation8], %s1582_s12  ;;  %s1894_s12 = sshll.u32 %s1978_s17, 4  ;;  %s1895_s12 = int_to_ptr.vmem [resolvable:$false] %s1894_s12 }
 0x4df   : > { %s1495_s30 = sshll.u32 %s387_s29, 4  ;;  %s1896_s1 = scalar_lea.vmem %s1895_s12, 256  ;;  %s1496_s30 = int_to_ptr.vmem [resolvable:$true] %s1495_s30 }
 0x4e0   : > { %v1003_v33 = vpop.f32.mrf.mxu1  ;;  %s1890_s16 = scalar_lea.vmem %s1496_s30, 128  ;;  %p1897_p1 = scmp.lt.s32.totalorder %s1496_s30, %s1895_s12 }
 0x4e1   : > { %v1008_v35 = vmul.f32 %v1829_v32, %v1003_v33  ;;  %p1891_p9 = scmp.ne.s32.totalorder %s1496_s30, %s1890_s16  ;;  %p1898_p2 = scmp.lt.s32.totalorder %s1896_s1, %s1890_s16 }
 0x4e2   : > { %v1689_v36 = vpop.f32.mrf.mxu1 }
 0x4e3   : > { %1010 = vrot.lane.b32.xlu0 %v1008_v35, %s1976_s21  ;;  %p1892_p13 = pnand %p1891_p9, %p2439_p11  ;;  %p1899_p0 = por %p1898_p2, %p1897_p1 }
 0x4e5   : > { %p1893_p10 = pneg %p1892_p13 }
 0x4e7   : > { %p1900_p3 = pnand %p1899_p0, %p1893_p10 }
 0x4e8   : > { %v1175_v39 = vpop.f32.mrf.mxu1 }
 0x4e9   : > { %v1180_v40 = vmul.f32 %v1831_v38, %v1175_v39 }
 0x4ea   : > { %v1699_v41 = vpop.f32.mrf.mxu1 }
 0x4eb   : > { %1182 = vrot.lane.b32.xlu1 %v1180_v40, %s1977_s23 }
 0x550   : > { %v839_v42 = vpop.permute.xlu1 %838 }
 0x551   : > { %842 = vst.msk [vmem:[#allocation2] sm:$0xff] %vm841_vm4, %v839_v42 }
 0x555   : > { %v1011_v43 = vpop.permute.xlu0 %1010 }
 0x556   : > { %1014 = vst.msk [vmem:[#allocation2] sm:$0xff] %vm1013_vm5, %v1011_v43 }
 0x55d   : > { %v1183_v44 = vpop.permute.xlu1 %1182 }
 0x55e   : > { %1186 = vst.msk [vmem:[#allocation2] sm:$0xff] %vm1185_vm6, %v1183_v44 }
 0x565   : > { %v1187_v45 = vld [vmem:[#allocation2] sm:$0xff] }
 0x566   : > { %1709 = vmatmul.mubr.msk.f32.vlgmr.msra.gmra.mxu0 %vm390_vm0, %v1187_v45 }
 0x567   : > { %1738 = vmatprep.mubr.msk.f32.mxu0 %vm1963_vm1, %v1962_v8  ;;  %1723 = vmatpush3.msra.mxu0 %v1397_v9 }
 0x568   : > { %1724 = vmatprep.subr.mxu0 %v1962_v8 }
 0x569   : > { %1725 = vmatpush3.msra.mxu0 %v1396_v16 }
 0x56a   : > { %1726 = vmatprep.subr.mxu0 %v1962_v8 }
 0x56b   : > { %1727 = vmatpush3.msra.mxu0 %v1395_v18 }
 0x56c   : > { %1728 = vmatprep.subr.mxu0 %v1962_v8 }
 0x56d   : > { %1729 = vmatpush3.msra.mxu0 %v1394_v10 }
 0x56e   : > { %1730 = vmatprep.subr.mxu0 %v1962_v8 }
 0x56f   : > { %1731 = vmatpush3.msra.mxu0 %v1393_v11 }
 0x570   : > { %1732 = vmatprep.subr.mxu0 %v1962_v8 }
 0x571   : > { %1733 = vmatpush3.msra.mxu0 %v1392_v12 }
 0x572   : > { %1734 = vmatprep.subr.mxu0 %v1962_v8 }
 0x573   : > { %1735 = vmatpush3.msra.mxu0 %v1391_v13 }
 0x574   : > { %1736 = vmatprep.subr.mxu0 %v1962_v8 }
 0x575   : > { %1737 = vmatpush3.msra.mxu0 %v1390_v14 }
 0x626   : > { %v1261_v46 = vpop.f32.mrf.mxu0 }
 0x627   : > { %v1265_v48 = vadd.f32 %v1261_v46, %v2167_v0  ;;  %v1299_v0 = vld [vmem:[%s2408_s6 + $0x10] sm:$0xff] }
 0x628   : > { %v1710_v49 = vpop.f32.mrf.mxu0  ;;  %1714 = vmatpush3.msra.mxu1 %v1299_v0 }
 0x629   : > { %v2300_v50 = vadd.f32 %v1600_v47, %v1265_v48  ;;  %1715 = vmatprep.subr.mxu1 %v1962_v8 }
 0x62a   : > { %1716 = vmatpush3.msra.mxu1 %v1298_v58 }
 0x62b   : > { %v1274_v51 = vsel %vm390_vm0, %v2300_v50, 0.0  ;;  %1717 = vmatprep.subr.mxu1 %v1962_v8 }
 0x62c   : > { %1275 = vadd.xlane.f32.xlu1 %v1274_v51  ;;  %1718 = vmatpush3.msra.mxu1 %v1297_v59 }
 0x6b5   : > { %v1276_v52 = vpop.xlane.xlu1 %1275 }
 0x6b6   : > { %v1277_v53 = vmul.f32 0.03125, %v1276_v52 }
 0x6b8   : > { %v1278_v54 = vsub.f32 %v2300_v50, %v1277_v53 }
 0x6ba   : > { %v1279_v55 = vmul.f32 %v1278_v54, %v1278_v54 }
 0x6bc   : > { %v1280_v56 = vsel %vm390_vm0, %v1279_v55, 0.0 }
 0x6bd   : > { %1281 = vadd.xlane.f32.xlu0 %v1280_v56 }
 0x746   : > { %v1282_v60 = vpop.xlane.xlu0 %1281 }
 0x747   : > { %v1283_v61 = vmul.f32 0.03125, %v1282_v60 }
 0x749   : > { %v1284_v62 = vadd.f32 1e-05, %v1283_v61 }
 0x74b   : > { %1832 = vrsqrt.f32 %v1284_v62 }
 0x758   : > { %v1833_v3 = vpop.eup %1832 }
 0x759   : > { %v1286_v4 = vmul.f32 %v1833_v3, %v1278_v54 }
 0x75b   : > { %v1291_v6 = vmul.f32 %v1290_v2, %v1286_v4 }
 0x75d   : > { %v1296_v7 = vadd.f32 %v1295_v5, %v1291_v6 }
 0x75f   : > { %1720 = vmatmul.mubr.msk.f32.vlgmr.msra.gmra.mxu1 %vm390_vm0, %v1296_v7 }
 0x81f   : > { %v1377_v17 = vpop.f32.mrf.mxu1 }
 0x820   : > { %v1378_v19 = vadd.f32 %v1601_v15, %v1377_v17 }
 0x821   : > { %v1721_v20 = vpop.f32.mrf.mxu1 }
 0x822   : > { %v1381_v21 = vmul.f32 %v1378_v19, %v1378_v19 }
 0x824   : > { %v1382_v22 = vmul.f32 %v1381_v21, %v1378_v19 }
 0x826   : > { %v1383_v23 = vmul.f32 0.044715, %v1382_v22 }
 0x828   : > { %v1384_v24 = vadd.f32 %v1383_v23, %v1378_v19 }
 0x82a   : > { %v1385_v25 = vmul.f32 0.7978846, %v1384_v24 }
 0x82c   : > { %1834 = vtanh.f32 %v1385_v25 }
 0x839   : > { %v1835_v26 = vpop.eup %1834 }
 0x83a   : > { %v1387_v27 = vadd.f32 1.0, %v1835_v26 }
 0x83c   : > { %v1388_v8 = vmul.f32 0.5, %v1387_v27 }
 0x83e   : > { %v1389_v28 = vmul.f32 %v1388_v8, %v1378_v19 }
 0x840   : > { %1739 = vmatmul.mubr.msk.f32.vlgmr.msra.gmra.mxu0 %vm1405_vm7, %v1389_v28 }
 0x900   : > { %v1475_v30 = vpop.f32.mrf.mxu0 }
 0x901   : > { %v1476_v31 = vadd.f32 %v1603_v29, %v1475_v30 }
 0x902   : > { %v1740_v32 = vpop.f32.mrf.mxu0 }
 0x903   : > { %v1479_v33 = vadd.f32 %v1476_v31, %v2300_v50 }
 0x905   : > { %1480 = vst.msk [vmem:[%s387_s29] sm:$0xff] %vm390_vm0, %v1479_v33 }
 0x906   : > { %1903 = shalt.err (!%p1900_p3)
}
 0x907   : > { %s1904_s19 = scalar_lea.hbm %s1493_s22, 128  ;;  %s1908_s23 = scalar_lea.hbm %s2412_s10, 256 }
 0x908   : > { %p1905_p12 = scmp.ne.s32.totalorder %s1493_s22, %s1904_s19  ;;  %p1909_p4 = scmp.lt.s32.totalorder %s1493_s22, %s2412_s10 }
 0x909   : > { %p1910_p6 = scmp.lt.s32.totalorder %s1908_s23, %s1904_s19 }
 0x90a   : > { %p1906_p5 = pnand %p1905_p12, %p2439_p11 }
 0x90b   : > { %p1911_p8 = por %p1910_p6, %p1909_p4 }
 0x90c   : > { %p1907_p7 = pneg %p1906_p5 }
 0x90e   : > { %p1912_p9 = pnand %p1911_p8, %p1907_p7 }
 0x910   : > { %1915 = shalt.err (!%p1912_p9)
}
 0x911   : > { %1747 = dma.vmem_to_hbm [thread:$0]  (%p2439_p11), %s1496_s30, 128, %s1493_s22, %s1482_s24  }
 0x912 PF: > { %s2440_s26 = sld [smem:[#allocation13_spill]]  ;;  %s1507_s29 = sand.u32 1, %s1946_s13  }
 0x913   : > { %p2441_p13 = scmp.ne.s32.totalorder %s2425_s20, 0  ;;  %s1508_s25 = scalar_lea.sflag [#allocation5], %s1507_s29 }
 0x918   : > { %p2442_p10 = scmp.ge.s32.totalorder %s2440_s26, 2 }
 0x91a   : > { %p1758_p1 = pnand %p2442_p10, %p2441_p13 }
 0x91c   : > { %p1759_p2 = pneg %p1758_p1 }
 0x91e   : > { %1941 = dma.done.wait (%p1759_p2), %s1508_s25, 128  }
 0x91f   : > { %1943 = vsyncadd (%p1759_p2), %s1508_s25, 4294967168  ;;  %s2443_s16 = sld [smem:[#allocation14_spill]]  ;;  %s2446_s13 = smov %s1950_s14 }
 0x920   : > { %s2444_s27 = sld [smem:[#allocation12_spill]] }
 0x921   : > { %s2445_s15 = sld [smem:[#allocation15_spill]] }
 0x925   : > { %p24_p0 = scmp.ge.s32.totalorder %s2443_s16, 4  }
 0x926   : > { %s2447_s14 = smov %s2444_s27 }
 0x927   :  { %26 = sbr.rel (!%p24_p0) target bundleno = 8 (0x8), region = 109 }
 0x92c   :  { %1513 = vsyncpa [#allocation4], 1 }
 0x92d   :  { %1515 = vsyncpa [#allocation4 + $0x1], 1 }
 0x92e   :  { %1516 = vsyncpa [#allocation7], 1 }
 0x92f   :  { %1517 = vsyncpa [#allocation5], 1 }
 0x930   :  { %1519 = vsyncpa [#allocation5 + $0x1], 1 }

</bundles_post_ra>
